<compile_context>
chip_gen: v5e
topology: v5e:2x2
jax: 0.10.0
libtpu: 0.0.40
codegen_flags: <defaults>
</compile_context>

<pallas_src>
import jax
import jax.numpy as jnp
from jax.experimental import pallas as pl
from jax.experimental.pallas import tpu as pltpu

BN_EPS = 1e-5
LANE = 128


def _round_up(n, m):
    return ((n + m - 1) // m) * m


def _pad_to(x, shape):
    widths = [(0, t - s) for s, t in zip(x.shape, shape)]
    return jnp.pad(x, widths)


def _padded_width(in_channels_dict, hidden, num_classes):
    dims = [hidden, num_classes, 1] + [max(c, 1) for c in in_channels_dict.values()]
    return _round_up(max(dims), LANE)


def _stack_layout(node_types, edge_types, num_layers):
    """Deterministic packing order for the weight and bias stacks."""
    w_idx, b_idx = {}, {}
    wi = bi = 0
    for nt in node_types:
        w_idx[("lin", nt)] = wi; wi += 1
        b_idx[("lin", nt)] = bi; bi += 1
    for L in range(num_layers):
        for et in edge_types:
            w_idx[("w1", L, et)] = wi; wi += 1
            w_idx[("w2", L, et)] = wi; wi += 1
            b_idx[("b1", L, et)] = bi; bi += 1
            b_idx[("gamma", L, et)] = bi; bi += 1
            b_idx[("beta", L, et)] = bi; bi += 1
            b_idx[("b2", L, et)] = bi; bi += 1
    w_idx[("final",)] = wi; wi += 1
    b_idx[("final",)] = bi; bi += 1
    return w_idx, wi, b_idx, bi


# ---------------------------------------------------------------------------
# Parameter init (deterministic, synthetic — mirrors module __init__ shapes).
# Weights stored [in, out] (PyTorch W transposed) so the kernel never transposes.
# ---------------------------------------------------------------------------
def init_params(key, node_types, edge_types, in_channels_dict,
                hidden, num_layers, num_classes):
    n_keys = len(node_types) * 2 + num_layers * len(edge_types) * 4 + 2
    keys = iter(jax.random.split(key, n_keys))

    def nrm(shape, scale=0.1):
        return scale * jax.random.normal(next(keys), shape, jnp.float32)

    params = {"lins": {}, "convs": [], "final": None}
    for nt in node_types:
        cin = in_channels_dict[nt]
        # TODO(synk): featureless node types (in_channels == 0 -> nn.Embedding
        # dynamically resized on device) are host-side control flow; only the
        # Linear branch is implemented here.
        params["lins"][nt] = (nrm((cin, hidden)), nrm((1, hidden)))
    for _ in range(num_layers):
        layer = {}
        for et in edge_types:
            layer[et] = dict(
                eps=jnp.zeros((1,), jnp.float32),          # train_eps init = 0
                w1=nrm((hidden, hidden)), b1=nrm((1, hidden)),
                gamma=jnp.ones((1, hidden), jnp.float32),  # BN default init
                beta=jnp.zeros((1, hidden), jnp.float32),
                w2=nrm((hidden, hidden)), b2=nrm((1, hidden)),
            )
        params["convs"].append(layer)
    params["final"] = (nrm((hidden, num_classes)), nrm((1, num_classes)))
    return params


# ---------------------------------------------------------------------------
# Pack + pad + cast parameters once (layout prep, outside the hot path).
# ---------------------------------------------------------------------------
def prepare_params(params, node_types, edge_types, in_channels_dict,
                   hidden, num_layers, num_classes):
    node_types = tuple(node_types)
    edge_types = tuple(tuple(et) for et in edge_types)
    P = _padded_width(in_channels_dict, hidden, num_classes)
    w_idx, n_w, b_idx, n_b = _stack_layout(node_types, edge_types, num_layers)

    w_stack = [None] * n_w
    b_stack = [None] * n_b

    def put_w(key, w):
        w_stack[w_idx[key]] = _pad_to(w, (P, P)).astype(jnp.bfloat16)

    def put_b(key, b):
        b_stack[b_idx[key]] = _pad_to(b.reshape(1, -1), (1, P)).astype(jnp.float32)

    for nt in node_types:
        w, b = params["lins"][nt]
        put_w(("lin", nt), w)
        put_b(("lin", nt), b)

    eps_list = []
    for L in range(num_layers):
        for et in edge_types:
            p = params["convs"][L][et]
            eps_list.append(p["eps"].reshape(()))
            put_w(("w1", L, et), p["w1"])
            put_w(("w2", L, et), p["w2"])
            put_b(("b1", L, et), p["b1"])
            put_b(("gamma", L, et), p["gamma"])
            put_b(("beta", L, et), p["beta"])
            put_b(("b2", L, et), p["b2"])

    wf, bf = params["final"]
    put_w(("final",), wf)
    put_b(("final",), bf)

    return {
        "w": jnp.stack(w_stack),                      # [n_w, P, P] bf16
        "b": jnp.concatenate(b_stack, axis=0),        # [n_b, P]     f32
        "eps": (jnp.stack(eps_list) if eps_list
                else jnp.zeros((1,), jnp.float32)),   # SMEM scalars
    }


# ---------------------------------------------------------------------------
# Dense adjacency, built ONCE outside jit for a static graph (per review: the
# per-call scatter + cast + HBM round-trip costs more than the whole kernel).
# ---------------------------------------------------------------------------
def build_adjacency(edge_index_dict, edge_types, num_nodes_dict):
    edge_types = tuple(tuple(et) for et in edge_types)
    nd_max = max(num_nodes_dict[et[2]] for et in edge_types)
    ns_max = max(num_nodes_dict[et[0]] for et in edge_types)
    mats = []
    for et in edge_types:
        src, _, dst = et
        ei = edge_index_dict[et]
        a = jnp.zeros((num_nodes_dict[dst], num_nodes_dict[src]), jnp.float32)
        a = a.at[ei[1], ei[0]].add(1.0)
        mats.append(_pad_to(a, (nd_max, ns_max)))
    # exact in bf16 for edge multiplicities <= 256
    return jnp.stack(mats).astype(jnp.bfloat16)       # [n_et, NDmax, NSmax]


# ---------------------------------------------------------------------------
# Fused forward builder: returns forward(prepped_params, x_dict, adj_stack)
# ---------------------------------------------------------------------------
def build_hetero_gin(node_types, edge_types, in_channels_dict, hidden,
                     num_layers, num_classes, num_nodes_dict):
    node_types = tuple(node_types)
    edge_types = tuple(tuple(et) for et in edge_types)
    n_et = len(edge_types)
    P = _padded_width(in_channels_dict, hidden, num_classes)
    w_idx, _, b_idx, _ = _stack_layout(node_types, edge_types, num_layers)
    nodes = dict(num_nodes_dict)
    n_max = max(nodes[nt] for nt in node_types)

    # PyG's HeteroConv drops node types with no incoming edge type; if such a
    # type is later read (as a src or as 'author'), the torch module would
    # KeyError.  Refuse that configuration up front instead of silently
    # changing semantics.
    dst_types = {et[2] for et in edge_types}
    needed = {et[0] for et in edge_types} | {"author"}
    if num_layers > 0 and not needed.issubset(dst_types):
        raise NotImplementedError(
            "node type with no incoming edge type is read downstream; "
            "matches a PyTorch-side KeyError, not supported here")

    # group edge types by dst (for the fused K-concat w2 matmul)
    et_by_dst = {nt: [(ei, et) for ei, et in enumerate(edge_types) if et[2] == nt]
                 for nt in node_types}

    def kernel(eps_ref, x_ref, adj_ref, w_ref, b_ref, out_ref):
        def bias(key):                       # (1, P) f32 row, static slice
            return b_ref[pl.ds(b_idx[key], 1), :]

        # 1) per-node-type input projection (bf16 MXU, f32 accumulate)
        h = {}
        for i, nt in enumerate(node_types):
            x = x_ref[i][:nodes[nt], :]
            h[nt] = (jnp.dot(x, w_ref[w_idx[("lin", nt)]],
                             preferred_element_type=jnp.float32)
                     + bias(("lin", nt)))

        # 2) HeteroConv(GINConv) layers, aggr='sum' over edge types, then ReLU
        for L in range(num_layers):
            # hoist bf16 casts: once per layer per node type
            h_bf = {nt: h[nt].astype(jnp.bfloat16) for nt in node_types}
            new_h = {}
            for nt in node_types:
                ets = et_by_dst[nt]
                if not ets:
                    continue
                g_parts, w2_parts, b2_sum = [], [], None
                for ei, et in ets:
                    src = et[0]
                    eps = eps_ref[L * n_et + ei]
                    adj = adj_ref[ei][:nodes[nt], :nodes[src]]   # at point of use
                    agg = jnp.dot(adj, h_bf[src],
                                  preferred_element_type=jnp.float32)
                    # TODO(synk): fold (1+eps)*h_dst into an augmented
                    # adjacency [(1+eps)I | adj] built host-side at scale.
                    g = (1.0 + eps) * h[nt] + agg
                    g = (jnp.dot(g.astype(jnp.bfloat16),
                                 w_ref[w_idx[("w1", L, et)]],
                                 preferred_element_type=jnp.float32)
                         + bias(("b1", L, et)))
                    # BatchNorm1d: training-mode batch statistics, f32 math,
                    # micro-fused (centered once, gamma folded into rsqrt row).
                    # (running-stats update not modeled — forward only)
                    mean = jnp.mean(g, axis=0, keepdims=True)
                    centered = g - mean
                    var = jnp.mean(centered * centered, axis=0, keepdims=True)
                    scale = bias(("gamma", L, et)) * jax.lax.rsqrt(var + BN_EPS)
                    g = centered * scale + bias(("beta", L, et))
                    g = jnp.maximum(g, 0.0)
                    g_parts.append(g.astype(jnp.bfloat16))
                    w2_parts.append(w_ref[w_idx[("w2", L, et)]])
                    b2 = bias(("b2", L, et))
                    b2_sum = b2 if b2_sum is None else b2_sum + b2
                # fused cross-edge-type sum:
                #   sum_et(g_et @ w2_et + b2_et) == concat(g) @ concat(w2) + sum(b2)
                g_cat = (g_parts[0] if len(g_parts) == 1
                         else jnp.concatenate(g_parts, axis=1))
                w_cat = (w2_parts[0] if len(w2_parts) == 1
                         else jnp.concatenate(w2_parts, axis=0))
                out_nt = (jnp.dot(g_cat, w_cat,
                                  preferred_element_type=jnp.float32)
                          + b2_sum)
                new_h[nt] = jnp.maximum(out_nt, 0.0)   # trailing F.relu
            for nt in node_types:
                if nt in new_h:
                    h[nt] = new_h[nt]

        # 3) final classifier on 'author' nodes (lane-padded classes)
        out_ref[...] = (jnp.dot(h["author"].astype(jnp.bfloat16),
                                w_ref[w_idx[("final",)]],
                                preferred_element_type=jnp.float32)
                        + bias(("final",)))

    def forward(prepped, x_dict, adj_stack):
        # lane-pad inputs to P, row-pad to a common count, stack, cast to bf16
        xs = []
        for nt in node_types:
            xs.append(_pad_to(x_dict[nt].astype(jnp.float32), (n_max, P)))
        x_stack = jnp.stack(xs).astype(jnp.bfloat16)   # [n_nt, Nmax, P]

        n_author = nodes["author"]

        def vspec(shape):
            return pl.BlockSpec(shape, lambda i: (0,) * len(shape))

        out = pl.pallas_call(
            kernel,
            out_shape=jax.ShapeDtypeStruct((n_author, P), jnp.float32),
            grid=(1,),
            in_specs=[
                pl.BlockSpec(memory_space=pltpu.MemorySpace.SMEM),  # eps
                vspec(x_stack.shape),
                vspec(adj_stack.shape),
                vspec(prepped["w"].shape),
                vspec(prepped["b"].shape),
            ],
            out_specs=vspec((n_author, P)),
            compiler_params=pltpu.CompilerParams(
                # TODO(synk): when dst-row tiling lands, make dst rows a
                # leading "parallel" axis so v7x's 2nd TensorCore is used.
                dimension_semantics=("arbitrary",),
                # v5e scoped default is 16 MiB; 32 MiB is safe on all chips.
                vmem_limit_bytes=32 * 1024 * 1024,
            ),
        )(prepped["eps"], x_stack, adj_stack, prepped["w"], prepped["b"])
        return out[:, :num_classes]

    return forward


if __name__ == "__main__":
    node_types = ["author", "paper"]
    edge_types = [("author", "writes", "paper"),
                  ("paper", "written_by", "author")]
    in_channels_dict = {"author": 8, "paper": 16}
    hidden_channels = 32
    num_layers = 2
    num_classes = 8
    num_nodes = {"author": 16, "paper": 16}
    num_edges = 32

    key = jax.random.PRNGKey(0)
    keys = jax.random.split(key, 8)

    x_dict = {
        "author": jax.random.normal(keys[0], (num_nodes["author"], 8),
                                    jnp.float32),
        "paper": jax.random.normal(keys[1], (num_nodes["paper"], 16),
                                   jnp.float32),
    }
    edge_index_dict = {
        ("author", "writes", "paper"): jnp.stack([
            jax.random.randint(keys[2], (num_edges,), 0, num_nodes["author"]),
            jax.random.randint(keys[3], (num_edges,), 0, num_nodes["paper"]),
        ]).astype(jnp.int32),
        ("paper", "written_by", "author"): jnp.stack([
            jax.random.randint(keys[4], (num_edges,), 0, num_nodes["paper"]),
            jax.random.randint(keys[5], (num_edges,), 0, num_nodes["author"]),
        ]).astype(jnp.int32),
    }

    params = init_params(keys[6], node_types, edge_types, in_channels_dict,
                         hidden_channels, num_layers, num_classes)
    prepped = prepare_params(params, node_types, edge_types, in_channels_dict,
                             hidden_channels, num_layers, num_classes)

    # Static graph: build the stacked dense adjacency once, OUTSIDE jit.
    adj_stack = build_adjacency(edge_index_dict, edge_types, num_nodes)

    forward = build_hetero_gin(node_types, edge_types, in_channels_dict,
                               hidden_channels, num_layers, num_classes,
                               num_nodes)
    forward = jax.jit(forward)

    out = forward(prepped, x_dict, adj_stack)
    out = jax.block_until_ready(out)
    assert out.shape == (num_nodes["author"], num_classes), out.shape
    assert jnp.all(jnp.isfinite(out))
    print("KERNEL_OK")
</pallas_src>

<mosaic_0001>
module attributes {stable_mosaic.version = 11 : i64} {
  func.func @kernel(%arg0: i32, %arg1: memref<4xf32, #tpu.memory_space<smem>>, %arg2: memref<2x16x128xbf16, #tpu.memory_space<vmem>>, %arg3: memref<2x16x16xbf16, #tpu.memory_space<vmem>>, %arg4: memref<11x128x128xbf16, #tpu.memory_space<vmem>>, %arg5: memref<19x128xf32, #tpu.memory_space<vmem>>, %arg6: memref<16x128xf32, #tpu.memory_space<vmem>>) attributes {dimension_semantics = [#tpu.dimension_semantics<arbitrary>], iteration_bounds = array<i64: 1>, scalar_prefetch = 0 : i64, scratch_operands = 0 : i64, tpu.core_type = #tpu.core_type<tc>, window_params = [{transform_indices = @transform_0, window_bounds = array<i64: 4>}, {pipeline_mode = #tpu.pipeline_mode<synchronous>, transform_indices = @transform_1, window_bounds = array<i64: 2, 16, 128>}, {pipeline_mode = #tpu.pipeline_mode<synchronous>, transform_indices = @transform_2, window_bounds = array<i64: 2, 16, 16>}, {pipeline_mode = #tpu.pipeline_mode<synchronous>, transform_indices = @transform_3, window_bounds = array<i64: 11, 128, 128>}, {pipeline_mode = #tpu.pipeline_mode<synchronous>, transform_indices = @transform_4, window_bounds = array<i64: 19, 128>}, {pipeline_mode = #tpu.pipeline_mode<synchronous>, transform_indices = @transform_5, window_bounds = array<i64: 16, 128>}]} {
    %c0 = arith.constant 0 : index
    %c0_0 = arith.constant 0 : index
    %c0_1 = arith.constant 0 : index
    %0 = vector.load %arg2[%c0, %c0_0, %c0_1] : memref<2x16x128xbf16, #tpu.memory_space<vmem>>, vector<1x16x128xbf16>
    %1 = vector.shape_cast %0 : vector<1x16x128xbf16> to vector<16x128xbf16>
    %c0_2 = arith.constant 0 : index
    %c0_3 = arith.constant 0 : index
    %c0_4 = arith.constant 0 : index
    %2 = vector.load %arg4[%c0_2, %c0_3, %c0_4] : memref<11x128x128xbf16, #tpu.memory_space<vmem>>, vector<1x128x128xbf16>
    %3 = vector.shape_cast %2 : vector<1x128x128xbf16> to vector<128x128xbf16>
    %cst = arith.constant dense<0.000000e+00> : vector<16x128xf32>
    %4 = tpu.matmul %1, %3, %cst {dimension_numbers = #tpu.dot_dimension_numbers<[1], [0], [0], [1], [0, 0, 1, 1], [], []>} : vector<16x128xbf16>, vector<128x128xbf16>, vector<16x128xf32> -> vector<16x128xf32>
    %c0_5 = arith.constant 0 : index
    %c0_6 = arith.constant 0 : index
    %5 = vector.load %arg5[%c0_5, %c0_6] : memref<19x128xf32, #tpu.memory_space<vmem>>, vector<1x128xf32>
    %6 = vector.broadcast %5 : vector<1x128xf32> to vector<16x128xf32>
    %7 = arith.addf %4, %6 : vector<16x128xf32>
    %c1 = arith.constant 1 : index
    %c0_7 = arith.constant 0 : index
    %c0_8 = arith.constant 0 : index
    %8 = vector.load %arg2[%c1, %c0_7, %c0_8] : memref<2x16x128xbf16, #tpu.memory_space<vmem>>, vector<1x16x128xbf16>
    %9 = vector.shape_cast %8 : vector<1x16x128xbf16> to vector<16x128xbf16>
    %c1_9 = arith.constant 1 : index
    %c0_10 = arith.constant 0 : index
    %c0_11 = arith.constant 0 : index
    %10 = vector.load %arg4[%c1_9, %c0_10, %c0_11] : memref<11x128x128xbf16, #tpu.memory_space<vmem>>, vector<1x128x128xbf16>
    %11 = vector.shape_cast %10 : vector<1x128x128xbf16> to vector<128x128xbf16>
    %cst_12 = arith.constant dense<0.000000e+00> : vector<16x128xf32>
    %12 = tpu.matmul %9, %11, %cst_12 {dimension_numbers = #tpu.dot_dimension_numbers<[1], [0], [0], [1], [0, 0, 1, 1], [], []>} : vector<16x128xbf16>, vector<128x128xbf16>, vector<16x128xf32> -> vector<16x128xf32>
    %c1_13 = arith.constant 1 : index
    %c0_14 = arith.constant 0 : index
    %13 = vector.load %arg5[%c1_13, %c0_14] : memref<19x128xf32, #tpu.memory_space<vmem>>, vector<1x128xf32>
    %14 = vector.broadcast %13 : vector<1x128xf32> to vector<16x128xf32>
    %15 = arith.addf %12, %14 : vector<16x128xf32>
    %16 = arith.truncf %7 : vector<16x128xf32> to vector<16x128xbf16>
    %17 = arith.truncf %15 : vector<16x128xf32> to vector<16x128xbf16>
    %c1_15 = arith.constant 1 : index
    %18 = memref.load %arg1[%c1_15] : memref<4xf32, #tpu.memory_space<smem>>
    %c1_16 = arith.constant 1 : index
    %c0_17 = arith.constant 0 : index
    %c0_18 = arith.constant 0 : index
    %19 = vector.load %arg3[%c1_16, %c0_17, %c0_18] : memref<2x16x16xbf16, #tpu.memory_space<vmem>>, vector<1x16x16xbf16>
    %20 = vector.shape_cast %19 : vector<1x16x16xbf16> to vector<16x16xbf16>
    %cst_19 = arith.constant dense<0.000000e+00> : vector<16x128xf32>
    %21 = tpu.matmul %20, %17, %cst_19 {dimension_numbers = #tpu.dot_dimension_numbers<[1], [0], [0], [1], [0, 0, 1, 1], [], []>} : vector<16x16xbf16>, vector<16x128xbf16>, vector<16x128xf32> -> vector<16x128xf32>
    %cst_20 = arith.constant 1.000000e+00 : f32
    %22 = arith.addf %cst_20, %18 : f32
    %23 = vector.broadcast %22 : f32 to vector<16x128xf32>
    %24 = arith.mulf %23, %7 : vector<16x128xf32>
    %25 = arith.addf %24, %21 : vector<16x128xf32>
    %26 = arith.truncf %25 : vector<16x128xf32> to vector<16x128xbf16>
    %c4 = arith.constant 4 : index
    %c0_21 = arith.constant 0 : index
    %c0_22 = arith.constant 0 : index
    %27 = vector.load %arg4[%c4, %c0_21, %c0_22] : memref<11x128x128xbf16, #tpu.memory_space<vmem>>, vector<1x128x128xbf16>
    %28 = vector.shape_cast %27 : vector<1x128x128xbf16> to vector<128x128xbf16>
    %cst_23 = arith.constant dense<0.000000e+00> : vector<16x128xf32>
    %29 = tpu.matmul %26, %28, %cst_23 {dimension_numbers = #tpu.dot_dimension_numbers<[1], [0], [0], [1], [0, 0, 1, 1], [], []>} : vector<16x128xbf16>, vector<128x128xbf16>, vector<16x128xf32> -> vector<16x128xf32>
    %c6 = arith.constant 6 : index
    %c0_24 = arith.constant 0 : index
    %30 = vector.load %arg5[%c6, %c0_24] : memref<19x128xf32, #tpu.memory_space<vmem>>, vector<1x128xf32>
    %31 = vector.broadcast %30 : vector<1x128xf32> to vector<16x128xf32>
    %32 = arith.addf %29, %31 : vector<16x128xf32>
    %cst_25 = arith.constant dense<0.000000e+00> : vector<128xf32>
    %33 = vector.multi_reduction <add>, %32, %cst_25 [0] : vector<16x128xf32> to vector<128xf32>
    %34 = vector.shape_cast %33 : vector<128xf32> to vector<1x128xf32>
    %cst_26 = arith.constant 1.600000e+01 : f32
    %35 = vector.broadcast %cst_26 : f32 to vector<1x128xf32>
    %36 = arith.divf %34, %35 : vector<1x128xf32>
    %37 = vector.broadcast %36 : vector<1x128xf32> to vector<16x128xf32>
    %38 = arith.subf %32, %37 : vector<16x128xf32>
    %39 = arith.mulf %38, %38 : vector<16x128xf32>
    %cst_27 = arith.constant dense<0.000000e+00> : vector<128xf32>
    %40 = vector.multi_reduction <add>, %39, %cst_27 [0] : vector<16x128xf32> to vector<128xf32>
    %41 = vector.shape_cast %40 : vector<128xf32> to vector<1x128xf32>
    %cst_28 = arith.constant 1.600000e+01 : f32
    %42 = vector.broadcast %cst_28 : f32 to vector<1x128xf32>
    %43 = arith.divf %41, %42 : vector<1x128xf32>
    %c7 = arith.constant 7 : index
    %c0_29 = arith.constant 0 : index
    %44 = vector.load %arg5[%c7, %c0_29] : memref<19x128xf32, #tpu.memory_space<vmem>>, vector<1x128xf32>
    %cst_30 = arith.constant 9.99999974E-6 : f32
    %45 = vector.broadcast %cst_30 : f32 to vector<1x128xf32>
    %46 = arith.addf %43, %45 : vector<1x128xf32>
    %47 = math.rsqrt %46 : vector<1x128xf32>
    %48 = arith.mulf %44, %47 : vector<1x128xf32>
    %49 = vector.broadcast %48 : vector<1x128xf32> to vector<16x128xf32>
    %50 = arith.mulf %38, %49 : vector<16x128xf32>
    %c8 = arith.constant 8 : index
    %c0_31 = arith.constant 0 : index
    %51 = vector.load %arg5[%c8, %c0_31] : memref<19x128xf32, #tpu.memory_space<vmem>>, vector<1x128xf32>
    %52 = vector.broadcast %51 : vector<1x128xf32> to vector<16x128xf32>
    %53 = arith.addf %50, %52 : vector<16x128xf32>
    %cst_32 = arith.constant 0.000000e+00 : f32
    %54 = vector.broadcast %cst_32 : f32 to vector<16x128xf32>
    %55 = arith.maximumf %53, %54 : vector<16x128xf32>
    %56 = arith.truncf %55 : vector<16x128xf32> to vector<16x128xbf16>
    %c5 = arith.constant 5 : index
    %c0_33 = arith.constant 0 : index
    %c0_34 = arith.constant 0 : index
    %57 = vector.load %arg4[%c5, %c0_33, %c0_34] : memref<11x128x128xbf16, #tpu.memory_space<vmem>>, vector<1x128x128xbf16>
    %58 = vector.shape_cast %57 : vector<1x128x128xbf16> to vector<128x128xbf16>
    %c9 = arith.constant 9 : index
    %c0_35 = arith.constant 0 : index
    %59 = vector.load %arg5[%c9, %c0_35] : memref<19x128xf32, #tpu.memory_space<vmem>>, vector<1x128xf32>
    %cst_36 = arith.constant dense<0.000000e+00> : vector<16x128xf32>
    %60 = tpu.matmul %56, %58, %cst_36 {dimension_numbers = #tpu.dot_dimension_numbers<[1], [0], [0], [1], [0, 0, 1, 1], [], []>} : vector<16x128xbf16>, vector<128x128xbf16>, vector<16x128xf32> -> vector<16x128xf32>
    %61 = vector.broadcast %59 : vector<1x128xf32> to vector<16x128xf32>
    %62 = arith.addf %60, %61 : vector<16x128xf32>
    %cst_37 = arith.constant 0.000000e+00 : f32
    %63 = vector.broadcast %cst_37 : f32 to vector<16x128xf32>
    %64 = arith.maximumf %62, %63 : vector<16x128xf32>
    %c0_38 = arith.constant 0 : index
    %65 = memref.load %arg1[%c0_38] : memref<4xf32, #tpu.memory_space<smem>>
    %c0_39 = arith.constant 0 : index
    %c0_40 = arith.constant 0 : index
    %c0_41 = arith.constant 0 : index
    %66 = vector.load %arg3[%c0_39, %c0_40, %c0_41] : memref<2x16x16xbf16, #tpu.memory_space<vmem>>, vector<1x16x16xbf16>
    %67 = vector.shape_cast %66 : vector<1x16x16xbf16> to vector<16x16xbf16>
    %cst_42 = arith.constant dense<0.000000e+00> : vector<16x128xf32>
    %68 = tpu.matmul %67, %16, %cst_42 {dimension_numbers = #tpu.dot_dimension_numbers<[1], [0], [0], [1], [0, 0, 1, 1], [], []>} : vector<16x16xbf16>, vector<16x128xbf16>, vector<16x128xf32> -> vector<16x128xf32>
    %cst_43 = arith.constant 1.000000e+00 : f32
    %69 = arith.addf %cst_43, %65 : f32
    %70 = vector.broadcast %69 : f32 to vector<16x128xf32>
    %71 = arith.mulf %70, %15 : vector<16x128xf32>
    %72 = arith.addf %71, %68 : vector<16x128xf32>
    %73 = arith.truncf %72 : vector<16x128xf32> to vector<16x128xbf16>
    %c2 = arith.constant 2 : index
    %c0_44 = arith.constant 0 : index
    %c0_45 = arith.constant 0 : index
    %74 = vector.load %arg4[%c2, %c0_44, %c0_45] : memref<11x128x128xbf16, #tpu.memory_space<vmem>>, vector<1x128x128xbf16>
    %75 = vector.shape_cast %74 : vector<1x128x128xbf16> to vector<128x128xbf16>
    %cst_46 = arith.constant dense<0.000000e+00> : vector<16x128xf32>
    %76 = tpu.matmul %73, %75, %cst_46 {dimension_numbers = #tpu.dot_dimension_numbers<[1], [0], [0], [1], [0, 0, 1, 1], [], []>} : vector<16x128xbf16>, vector<128x128xbf16>, vector<16x128xf32> -> vector<16x128xf32>
    %c2_47 = arith.constant 2 : index
    %c0_48 = arith.constant 0 : index
    %77 = vector.load %arg5[%c2_47, %c0_48] : memref<19x128xf32, #tpu.memory_space<vmem>>, vector<1x128xf32>
    %78 = vector.broadcast %77 : vector<1x128xf32> to vector<16x128xf32>
    %79 = arith.addf %76, %78 : vector<16x128xf32>
    %cst_49 = arith.constant dense<0.000000e+00> : vector<128xf32>
    %80 = vector.multi_reduction <add>, %79, %cst_49 [0] : vector<16x128xf32> to vector<128xf32>
    %81 = vector.shape_cast %80 : vector<128xf32> to vector<1x128xf32>
    %cst_50 = arith.constant 1.600000e+01 : f32
    %82 = vector.broadcast %cst_50 : f32 to vector<1x128xf32>
    %83 = arith.divf %81, %82 : vector<1x128xf32>
    %84 = vector.broadcast %83 : vector<1x128xf32> to vector<16x128xf32>
    %85 = arith.subf %79, %84 : vector<16x128xf32>
    %86 = arith.mulf %85, %85 : vector<16x128xf32>
    %cst_51 = arith.constant dense<0.000000e+00> : vector<128xf32>
    %87 = vector.multi_reduction <add>, %86, %cst_51 [0] : vector<16x128xf32> to vector<128xf32>
    %88 = vector.shape_cast %87 : vector<128xf32> to vector<1x128xf32>
    %cst_52 = arith.constant 1.600000e+01 : f32
    %89 = vector.broadcast %cst_52 : f32 to vector<1x128xf32>
    %90 = arith.divf %88, %89 : vector<1x128xf32>
    %c3 = arith.constant 3 : index
    %c0_53 = arith.constant 0 : index
    %91 = vector.load %arg5[%c3, %c0_53] : memref<19x128xf32, #tpu.memory_space<vmem>>, vector<1x128xf32>
    %cst_54 = arith.constant 9.99999974E-6 : f32
    %92 = vector.broadcast %cst_54 : f32 to vector<1x128xf32>
    %93 = arith.addf %90, %92 : vector<1x128xf32>
    %94 = math.rsqrt %93 : vector<1x128xf32>
    %95 = arith.mulf %91, %94 : vector<1x128xf32>
    %96 = vector.broadcast %95 : vector<1x128xf32> to vector<16x128xf32>
    %97 = arith.mulf %85, %96 : vector<16x128xf32>
    %c4_55 = arith.constant 4 : index
    %c0_56 = arith.constant 0 : index
    %98 = vector.load %arg5[%c4_55, %c0_56] : memref<19x128xf32, #tpu.memory_space<vmem>>, vector<1x128xf32>
    %99 = vector.broadcast %98 : vector<1x128xf32> to vector<16x128xf32>
    %100 = arith.addf %97, %99 : vector<16x128xf32>
    %cst_57 = arith.constant 0.000000e+00 : f32
    %101 = vector.broadcast %cst_57 : f32 to vector<16x128xf32>
    %102 = arith.maximumf %100, %101 : vector<16x128xf32>
    %103 = arith.truncf %102 : vector<16x128xf32> to vector<16x128xbf16>
    %c3_58 = arith.constant 3 : index
    %c0_59 = arith.constant 0 : index
    %c0_60 = arith.constant 0 : index
    %104 = vector.load %arg4[%c3_58, %c0_59, %c0_60] : memref<11x128x128xbf16, #tpu.memory_space<vmem>>, vector<1x128x128xbf16>
    %105 = vector.shape_cast %104 : vector<1x128x128xbf16> to vector<128x128xbf16>
    %c5_61 = arith.constant 5 : index
    %c0_62 = arith.constant 0 : index
    %106 = vector.load %arg5[%c5_61, %c0_62] : memref<19x128xf32, #tpu.memory_space<vmem>>, vector<1x128xf32>
    %cst_63 = arith.constant dense<0.000000e+00> : vector<16x128xf32>
    %107 = tpu.matmul %103, %105, %cst_63 {dimension_numbers = #tpu.dot_dimension_numbers<[1], [0], [0], [1], [0, 0, 1, 1], [], []>} : vector<16x128xbf16>, vector<128x128xbf16>, vector<16x128xf32> -> vector<16x128xf32>
    %108 = vector.broadcast %106 : vector<1x128xf32> to vector<16x128xf32>
    %109 = arith.addf %107, %108 : vector<16x128xf32>
    %cst_64 = arith.constant 0.000000e+00 : f32
    %110 = vector.broadcast %cst_64 : f32 to vector<16x128xf32>
    %111 = arith.maximumf %109, %110 : vector<16x128xf32>
    %112 = arith.truncf %111 : vector<16x128xf32> to vector<16x128xbf16>
    %c3_65 = arith.constant 3 : index
    %113 = memref.load %arg1[%c3_65] : memref<4xf32, #tpu.memory_space<smem>>
    %c1_66 = arith.constant 1 : index
    %c0_67 = arith.constant 0 : index
    %c0_68 = arith.constant 0 : index
    %114 = vector.load %arg3[%c1_66, %c0_67, %c0_68] : memref<2x16x16xbf16, #tpu.memory_space<vmem>>, vector<1x16x16xbf16>
    %115 = vector.shape_cast %114 : vector<1x16x16xbf16> to vector<16x16xbf16>
    %cst_69 = arith.constant dense<0.000000e+00> : vector<16x128xf32>
    %116 = tpu.matmul %115, %112, %cst_69 {dimension_numbers = #tpu.dot_dimension_numbers<[1], [0], [0], [1], [0, 0, 1, 1], [], []>} : vector<16x16xbf16>, vector<16x128xbf16>, vector<16x128xf32> -> vector<16x128xf32>
    %cst_70 = arith.constant 1.000000e+00 : f32
    %117 = arith.addf %cst_70, %113 : f32
    %118 = vector.broadcast %117 : f32 to vector<16x128xf32>
    %119 = arith.mulf %118, %64 : vector<16x128xf32>
    %120 = arith.addf %119, %116 : vector<16x128xf32>
    %121 = arith.truncf %120 : vector<16x128xf32> to vector<16x128xbf16>
    %c8_71 = arith.constant 8 : index
    %c0_72 = arith.constant 0 : index
    %c0_73 = arith.constant 0 : index
    %122 = vector.load %arg4[%c8_71, %c0_72, %c0_73] : memref<11x128x128xbf16, #tpu.memory_space<vmem>>, vector<1x128x128xbf16>
    %123 = vector.shape_cast %122 : vector<1x128x128xbf16> to vector<128x128xbf16>
    %cst_74 = arith.constant dense<0.000000e+00> : vector<16x128xf32>
    %124 = tpu.matmul %121, %123, %cst_74 {dimension_numbers = #tpu.dot_dimension_numbers<[1], [0], [0], [1], [0, 0, 1, 1], [], []>} : vector<16x128xbf16>, vector<128x128xbf16>, vector<16x128xf32> -> vector<16x128xf32>
    %c14 = arith.constant 14 : index
    %c0_75 = arith.constant 0 : index
    %125 = vector.load %arg5[%c14, %c0_75] : memref<19x128xf32, #tpu.memory_space<vmem>>, vector<1x128xf32>
    %126 = vector.broadcast %125 : vector<1x128xf32> to vector<16x128xf32>
    %127 = arith.addf %124, %126 : vector<16x128xf32>
    %cst_76 = arith.constant dense<0.000000e+00> : vector<128xf32>
    %128 = vector.multi_reduction <add>, %127, %cst_76 [0] : vector<16x128xf32> to vector<128xf32>
    %129 = vector.shape_cast %128 : vector<128xf32> to vector<1x128xf32>
    %cst_77 = arith.constant 1.600000e+01 : f32
    %130 = vector.broadcast %cst_77 : f32 to vector<1x128xf32>
    %131 = arith.divf %129, %130 : vector<1x128xf32>
    %132 = vector.broadcast %131 : vector<1x128xf32> to vector<16x128xf32>
    %133 = arith.subf %127, %132 : vector<16x128xf32>
    %134 = arith.mulf %133, %133 : vector<16x128xf32>
    %cst_78 = arith.constant dense<0.000000e+00> : vector<128xf32>
    %135 = vector.multi_reduction <add>, %134, %cst_78 [0] : vector<16x128xf32> to vector<128xf32>
    %136 = vector.shape_cast %135 : vector<128xf32> to vector<1x128xf32>
    %cst_79 = arith.constant 1.600000e+01 : f32
    %137 = vector.broadcast %cst_79 : f32 to vector<1x128xf32>
    %138 = arith.divf %136, %137 : vector<1x128xf32>
    %c15 = arith.constant 15 : index
    %c0_80 = arith.constant 0 : index
    %139 = vector.load %arg5[%c15, %c0_80] : memref<19x128xf32, #tpu.memory_space<vmem>>, vector<1x128xf32>
    %cst_81 = arith.constant 9.99999974E-6 : f32
    %140 = vector.broadcast %cst_81 : f32 to vector<1x128xf32>
    %141 = arith.addf %138, %140 : vector<1x128xf32>
    %142 = math.rsqrt %141 : vector<1x128xf32>
    %143 = arith.mulf %139, %142 : vector<1x128xf32>
    %144 = vector.broadcast %143 : vector<1x128xf32> to vector<16x128xf32>
    %145 = arith.mulf %133, %144 : vector<16x128xf32>
    %c16 = arith.constant 16 : index
    %c0_82 = arith.constant 0 : index
    %146 = vector.load %arg5[%c16, %c0_82] : memref<19x128xf32, #tpu.memory_space<vmem>>, vector<1x128xf32>
    %147 = vector.broadcast %146 : vector<1x128xf32> to vector<16x128xf32>
    %148 = arith.addf %145, %147 : vector<16x128xf32>
    %cst_83 = arith.constant 0.000000e+00 : f32
    %149 = vector.broadcast %cst_83 : f32 to vector<16x128xf32>
    %150 = arith.maximumf %148, %149 : vector<16x128xf32>
    %151 = arith.truncf %150 : vector<16x128xf32> to vector<16x128xbf16>
    %c9_84 = arith.constant 9 : index
    %c0_85 = arith.constant 0 : index
    %c0_86 = arith.constant 0 : index
    %152 = vector.load %arg4[%c9_84, %c0_85, %c0_86] : memref<11x128x128xbf16, #tpu.memory_space<vmem>>, vector<1x128x128xbf16>
    %153 = vector.shape_cast %152 : vector<1x128x128xbf16> to vector<128x128xbf16>
    %c17 = arith.constant 17 : index
    %c0_87 = arith.constant 0 : index
    %154 = vector.load %arg5[%c17, %c0_87] : memref<19x128xf32, #tpu.memory_space<vmem>>, vector<1x128xf32>
    %cst_88 = arith.constant dense<0.000000e+00> : vector<16x128xf32>
    %155 = tpu.matmul %151, %153, %cst_88 {dimension_numbers = #tpu.dot_dimension_numbers<[1], [0], [0], [1], [0, 0, 1, 1], [], []>} : vector<16x128xbf16>, vector<128x128xbf16>, vector<16x128xf32> -> vector<16x128xf32>
    %156 = vector.broadcast %154 : vector<1x128xf32> to vector<16x128xf32>
    %157 = arith.addf %155, %156 : vector<16x128xf32>
    %cst_89 = arith.constant 0.000000e+00 : f32
    %158 = vector.broadcast %cst_89 : f32 to vector<16x128xf32>
    %159 = arith.maximumf %157, %158 : vector<16x128xf32>
    %160 = arith.truncf %159 : vector<16x128xf32> to vector<16x128xbf16>
    %c10 = arith.constant 10 : index
    %c0_90 = arith.constant 0 : index
    %c0_91 = arith.constant 0 : index
    %161 = vector.load %arg4[%c10, %c0_90, %c0_91] : memref<11x128x128xbf16, #tpu.memory_space<vmem>>, vector<1x128x128xbf16>
    %162 = vector.shape_cast %161 : vector<1x128x128xbf16> to vector<128x128xbf16>
    %cst_92 = arith.constant dense<0.000000e+00> : vector<16x128xf32>
    %163 = tpu.matmul %160, %162, %cst_92 {dimension_numbers = #tpu.dot_dimension_numbers<[1], [0], [0], [1], [0, 0, 1, 1], [], []>} : vector<16x128xbf16>, vector<128x128xbf16>, vector<16x128xf32> -> vector<16x128xf32>
    %c18 = arith.constant 18 : index
    %c0_93 = arith.constant 0 : index
    %164 = vector.load %arg5[%c18, %c0_93] : memref<19x128xf32, #tpu.memory_space<vmem>>, vector<1x128xf32>
    %165 = vector.broadcast %164 : vector<1x128xf32> to vector<16x128xf32>
    %166 = arith.addf %163, %165 : vector<16x128xf32>
    %c0_94 = arith.constant 0 : index
    %c0_95 = arith.constant 0 : index
    %167 = vector.load %arg6[%c0_94, %c0_95] : memref<16x128xf32, #tpu.memory_space<vmem>>, vector<16x128xf32>
    tpu.vector_store %arg6[%c0_94, %c0_95], %166 {strides = array<i32>} : memref<16x128xf32, #tpu.memory_space<vmem>>, vector<16x128xf32>,
    return
  }
  func.func @transform_0(%arg0: i32) -> i32 {
    %c0_i32 = arith.constant 0 : i32
    %c0_i32_0 = arith.constant 0 : i32
    return %c0_i32 : i32
  }
  func.func @transform_1(%arg0: i32) -> (i32, i32, i32) {
    %c0_i32 = arith.constant 0 : i32
    %c0_i32_0 = arith.constant 0 : i32
    %c0_i32_1 = arith.constant 0 : i32
    %c0_i32_2 = arith.constant 0 : i32
    return %c0_i32, %c0_i32_0, %c0_i32_1 : i32, i32, i32
  }
  func.func @transform_2(%arg0: i32) -> (i32, i32, i32) {
    %c0_i32 = arith.constant 0 : i32
    %c0_i32_0 = arith.constant 0 : i32
    %c0_i32_1 = arith.constant 0 : i32
    %c0_i32_2 = arith.constant 0 : i32
    return %c0_i32, %c0_i32_0, %c0_i32_1 : i32, i32, i32
  }
  func.func @transform_3(%arg0: i32) -> (i32, i32, i32) {
    %c0_i32 = arith.constant 0 : i32
    %c0_i32_0 = arith.constant 0 : i32
    %c0_i32_1 = arith.constant 0 : i32
    %c0_i32_2 = arith.constant 0 : i32
    return %c0_i32, %c0_i32_0, %c0_i32_1 : i32, i32, i32
  }
  func.func @transform_4(%arg0: i32) -> (i32, i32) {
    %c0_i32 = arith.constant 0 : i32
    %c0_i32_0 = arith.constant 0 : i32
    %c0_i32_1 = arith.constant 0 : i32
    return %c0_i32, %c0_i32_0 : i32, i32
  }
  func.func @transform_5(%arg0: i32) -> (i32, i32) {
    %c0_i32 = arith.constant 0 : i32
    %c0_i32_0 = arith.constant 0 : i32
    %c0_i32_1 = arith.constant 0 : i32
    return %c0_i32, %c0_i32_0 : i32, i32
  }
}

</mosaic_0001>

<bundles_post_ra>
// kernel: forward.1
= control target key start
LH: loop header
LB: loop body
LE: loop exit
PB: predicated region body
PF: predicated region fallthrough
CT: control target
= control target key end

     0   :  { %10 = vsyncpa [#allocation4], 0  ;;  %s1630_s0 = inlined_call_operand.vmem [shape: f32[4], index: 0, kind: input, shape index: {}]   ;;  %s1631_s1 = inlined_call_operand.vmem [shape: bf16[2,16,128], index: 1, kind: input, shape index: {}]   ;;  %s1632_s2 = inlined_call_operand.vmem [shape: bf16[2,16,16], index: 2, kind: input, shape index: {}]   ;;  %s1633_s3 = inlined_call_operand.hbm [shape: bf16[11,128,128], index: 3, kind: input, shape index: {}]   ;;  %s1634_s4 = inlined_call_operand.vmem [shape: f32[19,128], index: 4, kind: input, shape index: {}]   ;;  %s1635_s5 = inlined_call_operand.vmem [shape: f32[16,128], index: 5, kind: output, shape index: {}]  }
   0x1   :  { %s17_s20 = sshll.u32 %s1630_s0, 4  ;;  %s18_s20 = int_to_ptr.vmem [resolvable:$true] %s17_s20 }
   0x2   :  { %11 = vsyncpa [#allocation3], 0  ;;  %s29_s23 = sshll.u32 %s1633_s3, 4  ;;  %s1491_s24 = smov [#allocation2]   ;;  %s30_s23 = int_to_ptr.hbm [resolvable:$true] %s29_s23 }
   0x3   :  { %20 = dma.vmem_to_smem %s18_s20, 16, %s1491_s24, [#allocation4]  }
   0x4   :  { %s1492_s25 = smov [#allocation5]   ;;  %s1493_s27 = smov 64  }
   0x5   :  { %s31_s26 = sshll.u32 %s1492_s25, 4  ;;  %s1494_s28 = smov 4   ;;  %s32_s26 = int_to_ptr.vmem [resolvable:$true] %s31_s26 }
   0x6   :  { %37 = dma.hbm_to_vmem [thread:$0]  %s30_s23, 11264, %s32_s26, [#allocation3], %s1493_s27, %s1493_s27, %s1494_s28  }
   0x7   :  { %1487 = dma.done.wait [#allocation4], 16  }
   0x8   :  { %1488 = vsyncadd [#allocation4], 4294967280 }
   0x9   :  { %1489 = dma.done.wait [#allocation3], 11264  }
   0xa   :  { %1490 = vsyncadd [#allocation3], 4294956032 }
   0xb   :  { %48 = sfence }
   0xc   :  { %v1358_v0 = vld [vmem:[#allocation5 + $0x38] sm:$0xff]  ;;  %v1357_v2 = vld [vmem:[#allocation5 + $0x30] sm:$0xff]  ;;  %v1356_v4 = vld [vmem:[#allocation5 + $0x28] sm:$0xff]  ;;  %vm239_vm0 = vcmask 130048   ;;  %s1111_s13 = sld [smem:[#allocation2 + $0x1]] }
   0xd   :  { %v1367_v1 = vld [vmem:[#allocation5 + $0x78] sm:$0xff]  ;;  %124 = vmatpush.bf16.msra.mxu0 %v1358_v0  ;;  %v1366_v3 = vld [vmem:[#allocation5 + $0x70] sm:$0xff]  ;;  %v1365_v5 = vld [vmem:[#allocation5 + $0x68] sm:$0xff]  ;;  %v1495_v0 = vmov 16.0   ;;  %s1252_s3 = sld [smem:[#allocation2 + $0x3]] }
   0xe   :  { %214 = vmatpush.bf16.msra.mxu1 %v1367_v1  ;;  %v1355_v6 = vld [vmem:[#allocation5 + $0x20] sm:$0xff]  ;;  %v1354_v8 = vld [vmem:[#allocation5 + $0x18] sm:$0xff]  ;;  %v1353_v10 = vld [vmem:[#allocation5 + $0x10] sm:$0xff]  ;;  %1443 = vrcp.f32 %v1495_v0 }
   0xf   :  { %v1364_v7 = vld [vmem:[#allocation5 + $0x60] sm:$0xff]  ;;  %v1363_v9 = vld [vmem:[#allocation5 + $0x58] sm:$0xff]  ;;  %v1362_v11 = vld [vmem:[#allocation5 + $0x50] sm:$0xff] }
  0x10   :  { %v1352_v12 = vld [vmem:[#allocation5 + $0x8] sm:$0xff]  ;;  %v1351_v14 = vld [vmem:[#allocation5] sm:$0xff]  ;;  %v1393_v18 = vld [vmem:[#allocation5 + $0xb8] sm:$0xff] }
  0x11   :  { %125 = vmatpush.bf16.msra.mxu0 %v1357_v2  ;;  %v1361_v13 = vld [vmem:[#allocation5 + $0x48] sm:$0xff]  ;;  %v1360_v15 = vld [vmem:[#allocation5 + $0x40] sm:$0xff]  ;;  %v1376_v19 = vld [vmem:[#allocation5 + $0x138] sm:$0xff] }
  0x12   :  { %215 = vmatpush.bf16.msra.mxu1 %v1366_v3  ;;  %v1350_v16 = vld [vmem:[%s1631_s1] sm:$0xff]  ;;  %v1359_v17 = vld [vmem:[%s1631_s1 + $0x8] sm:$0xff]  ;;  %v1392_v20 = vld [vmem:[#allocation5 + $0xb0] sm:$0xff]  ;;  %331 = vmatpush.bf16.msra.mxu3 %v1376_v19  ;;  %s257_s15 = sadd.f32 1.0, %s1111_s13 }
  0x13   :  { %v1375_v21 = vld [vmem:[#allocation5 + $0x130] sm:$0xff]  ;;  %v1391_v22 = vld [vmem:[#allocation5 + $0xa8] sm:$0xff]  ;;  %v1390_v24 = vld [vmem:[#allocation5 + $0xa0] sm:$0xff]  ;;  %s733_s1 = sadd.f32 1.0, %s1252_s3 }
  0x14   :  { %v1374_v23 = vld [vmem:[#allocation5 + $0x128] sm:$0xff]  ;;  %v1373_v25 = vld [vmem:[#allocation5 + $0x120] sm:$0xff]  ;;  %v1389_v26 = vld [vmem:[#allocation5 + $0x98] sm:$0xff]  ;;  %v258_v56 = vstv %s257_s15  ;;  %v1444_v2 = vpop.eup %1443 }
  0x15   :  { %126 = vmatpush.bf16.msra.mxu0 %v1356_v4  ;;  %v1432_v29 = vld [vmem:[%s1634_s4 + $0x1] ss:$0 sm:$0xff]  ;;  %v1431_v30 = vld [vmem:[%s1634_s4] ss:$0 sm:$0xff]  ;;  %v1547_v39 = vld [vmem:[%s1632_s2 + $0x8] sm:$0xff]  ;;  %v353_v4 = vmul.f32 16.0, %v1444_v2  ;;  %vm357_vm1 = vweird.f32 %v1444_v2 }
  0x16   :  { %216 = vmatpush.bf16.msra.mxu1 %v1365_v5  ;;  %332 = vmatpush.bf16.msra.mxu3 %v1375_v21  ;;  %v1385_v40 = vld [vmem:[%s1632_s2] sm:$0xff]  ;;  %v1388_v41 = vld [vmem:[#allocation5 + $0x90] sm:$0xff]  ;;  %v1372_v42 = vld [vmem:[#allocation5 + $0x118] sm:$0xff]  ;;  %s478_s2 = sld [smem:[#allocation2]] }
  0x17   :  { %v1387_v43 = vld [vmem:[#allocation5 + $0x88] sm:$0xff]  ;;  %v1371_v44 = vld [vmem:[#allocation5 + $0x110] sm:$0xff]  ;;  %v1386_v45 = vld [vmem:[#allocation5 + $0x80] sm:$0xff] }
  0x18   :  { %v1370_v46 = vld [vmem:[#allocation5 + $0x108] sm:$0xff]  ;;  %v1369_v47 = vld [vmem:[#allocation5 + $0x100] sm:$0xff] }
  0x19   :  { %127 = vmatpush.bf16.msra.mxu0 %v1355_v6  ;;  %v1433_v3 = vld [vmem:[%s1634_s4 + $0x2] ss:$0 sm:$0xff] }
  0x1a   :  { %217 = vmatpush.bf16.msra.mxu1 %v1364_v7  ;;  %333 = vmatpush.bf16.msra.mxu3 %v1374_v23 }
  0x1c   :  { %s503_s14 = sadd.f32 1.0, %s478_s2 }
  0x1d   :  { %128 = vmatpush.bf16.msra.mxu0 %v1354_v8  ;;  %v354_v8 = vsub.f32 1.0, %v353_v4 }
  0x1e   :  { %218 = vmatpush.bf16.msra.mxu1 %v1363_v9  ;;  %334 = vmatpush.bf16.msra.mxu3 %v1373_v25  ;;  %v504_v49 = vstv %s503_s14  ;;  %v1399_v25 = vld [vmem:[#allocation5 + $0xe8] sm:$0xff] }
  0x21   :  { %129 = vmatpush.bf16.msra.mxu0 %v1353_v10 }
  0x22   :  { %219 = vmatpush.bf16.msra.mxu1 %v1362_v11  ;;  %335 = vmatpush.bf16.msra.mxu3 %v1372_v42 }
  0x25   :  { %130 = vmatpush.bf16.msra.mxu0 %v1352_v12  ;;  %v355_v12 = vmul.f32 %v1444_v2, %v354_v8 }
  0x26   :  { %220 = vmatpush.bf16.msra.mxu1 %v1361_v13  ;;  %336 = vmatpush.bf16.msra.mxu3 %v1371_v44  ;;  %v1401_v13 = vld [vmem:[#allocation5 + $0xf8] sm:$0xff] }
  0x29   :  { %131 = vmatpush.bf16.msra.mxu0 %v1351_v14 }
  0x2a   :  { %221 = vmatpush.bf16.msra.mxu1 %v1360_v15  ;;  %337 = vmatpush.bf16.msra.mxu3 %v1370_v46  ;;  %v1396_v46 = vld [vmem:[#allocation5 + $0xd0] sm:$0xff] }
  0x2c   :  { %132 = vmatmul.bf16.vlgmr.msra.gmra.mxu0 %v1350_v16  ;;  %v1434_v16 = vld [vmem:[%s1634_s4 + $0x6] ss:$0 sm:$0xff] }
  0x2d   :  { %222 = vmatmul.bf16.vlgmr.msra.gmra.mxu1 %v1359_v17  ;;  %v356_v17 = vadd.f32 %v1444_v2, %v355_v12 }
  0x2e   :  { %577 = vmatpush.bf16.msrb.mxu1 %v1393_v18  ;;  %338 = vmatpush.bf16.msra.mxu3 %v1369_v47  ;;  %v1400_v18 = vld [vmem:[#allocation5 + $0xf0] sm:$0xff] }
  0x32   :  { %578 = vmatpush.bf16.msrb.mxu1 %v1392_v20  ;;  %701 = vmatpush.bf16.msrb.mxu3 %v1401_v13 }
  0x36   :  { %579 = vmatpush.bf16.msrb.mxu1 %v1391_v22  ;;  %702 = vmatpush.bf16.msrb.mxu3 %v1400_v18 }
  0x3a   :  { %580 = vmatpush.bf16.msrb.mxu1 %v1390_v24  ;;  %v1561_v24 = vsel %vm357_vm1, %v1444_v2, %v356_v17  ;;  %703 = vmatpush.bf16.msrb.mxu3 %v1399_v25  ;;  %v611_v17 = vld [vmem:[%s1634_s4 + $0x3] sm:$0x1]  ;;  %v1435_v25 = vld [vmem:[%s1634_s4 + $0x4] ss:$0 sm:$0xff] }
  0x3e   :  { %581 = vmatpush.bf16.msrb.mxu1 %v1389_v26 }
  0x42   :  { %582 = vmatpush.bf16.msrb.mxu1 %v1388_v41 }
  0x46   :  { %583 = vmatpush.bf16.msrb.mxu1 %v1387_v43 }
  0x4a   :  { %584 = vmatpush.bf16.msrb.mxu1 %v1386_v45  ;;  %v1382_v45 = vld [vmem:[#allocation5 + $0x168] sm:$0xff] }
  0xa9   :  { %v133_v27 = vpop.f32.mrf.mxu0 }
  0xaa   :  { %v223_v28 = vpop.f32.mrf.mxu1  ;;  %v134_v34 = vadd.f32 %v1431_v30, %v133_v27 }
  0xab   :  { %v224_v31 = vadd.f32 %v1432_v29, %v223_v28 }
  0xac   :  { %v259_v58 = vmul.f32 %v258_v56, %v134_v34 }
  0xad   :  { %v505_v51 = vmul.f32 %v504_v49, %v224_v31 }
  0xb1   :  { %v135_v32 = vpop.f32.mrf.mxu0 }
  0xb2   :  { %v225_v33 = vpop.f32.mrf.mxu1  ;;  %v136_v35 = vadd.f32 %v1431_v30, %v135_v32  ;;  %v1384_v30 = vld [vmem:[#allocation5 + $0x178] sm:$0xff] }
  0xb3   :  { %v226_v36 = vadd.f32 %v1432_v29, %v225_v33 }
  0xb4   :  { %v228_v38 = vpack.c.bf16 %v136_v35, %v134_v34  ;;  %v260_v59 = vmul.f32 %v258_v56, %v136_v35 }
  0xb5   :  { %v229_v37 = vpack.c.bf16 %v226_v36, %v224_v31  ;;  %v506_v52 = vmul.f32 %v504_v49, %v226_v36  ;;  %v1398_v31 = vld [vmem:[#allocation5 + $0xe0] sm:$0xff] }
  0xb6   :  { %496 = vmatpush.bf16.msrb.mxu0 %v228_v38  ;;  %704 = vmatpush.bf16.msrb.mxu3 %v1398_v31  ;;  %v1383_v38 = vld [vmem:[#allocation5 + $0x170] sm:$0xff] }
  0xb7   :  { %250 = vmatpush.bf16.msra.mxu2 %v229_v37 }
  0xb9   :  { %1187 = vmatmul.msk.bf16.vlgmr.msrb.gmra.mxu0 %vm239_vm0, %v1385_v40  ;;  %v1397_v40 = vld [vmem:[#allocation5 + $0xd8] sm:$0xff] }
  0xba   :  { %1118 = vmatmul.msk.bf16.vlgmr.msra.gmra.mxu2 %vm239_vm0, %v1547_v39  ;;  %705 = vmatpush.bf16.msrb.mxu3 %v1397_v40 }
  0xbb   :  { %462 = vmatpush.bf16.msrb.mxu2 %v1384_v30 }
  0xbe   :  { %706 = vmatpush.bf16.msrb.mxu3 %v1396_v46 }
  0xbf   :  { %463 = vmatpush.bf16.msrb.mxu2 %v1383_v38 }
  0xc3   :  { %464 = vmatpush.bf16.msrb.mxu2 %v1382_v45 }
 0x136   :  { %v498_v48 = vpop.f32.mrf.mxu0 }
 0x137   :  { %v507_v54 = vadd.f32 %v505_v51, %v498_v48  ;;  %v1381_v51 = vld [vmem:[#allocation5 + $0x160] sm:$0xff] }
 0x138   :  { %465 = vmatpush.bf16.msrb.mxu2 %v1381_v51  ;;  %v1408_v51 = vld [vmem:[#allocation5 + $0x230] sm:$0xff] }
 0x13d   :  { %v252_v50 = vpop.f32.mrf.mxu2 }
 0x13e   :  { %v500_v53 = vpop.f32.mrf.mxu0  ;;  %v261_v61 = vadd.f32 %v259_v58, %v252_v50 }
 0x13f   :  { %v508_v55 = vadd.f32 %v506_v52, %v500_v53  ;;  %v1395_v52 = vld [vmem:[#allocation5 + $0xc8] sm:$0xff] }
 0x140   :  { %707 = vmatpush.bf16.msrb.mxu3 %v1395_v52  ;;  %v1407_v52 = vld [vmem:[#allocation5 + $0x228] sm:$0xff] }
 0x141   :  { %v509_v57 = vpack.c.bf16 %v508_v55, %v507_v54 }
 0x143   :  { %585 = vmatmul.bf16.vlgmr.msrb.gmra.mxu1 %v509_v57 }
 0x145   :  { %v254_v60 = vpop.f32.mrf.mxu2 }
 0x146   :  { %v262_v62 = vadd.f32 %v260_v59, %v254_v60  ;;  %v1380_v59 = vld [vmem:[#allocation5 + $0x158] sm:$0xff]  ;;  %v1394_v60 = vld [vmem:[#allocation5 + $0xc0] sm:$0xff] }
 0x147   :  { %466 = vmatpush.bf16.msrb.mxu2 %v1380_v59  ;;  %708 = vmatpush.bf16.msrb.mxu3 %v1394_v60 }
 0x148   :  { %v263_v63 = vpack.c.bf16 %v262_v62, %v261_v61 }
 0x14a   :  { %339 = vmatmul.bf16.vlgmr.msra.gmra.mxu3 %v263_v63 }
 0x1c0   :  { %v586_v1 = vpop.f32.mrf.mxu1 }
 0x1c1   :  { %v587_v6 = vadd.f32 %v1433_v3, %v586_v1  ;;  %v1379_v1 = vld [vmem:[#allocation5 + $0x150] sm:$0xff] }
 0x1c2   :  { %467 = vmatpush.bf16.msrb.mxu2 %v1379_v1  ;;  %v1402_v1 = vld [vmem:[#allocation5 + $0x200] sm:$0xff] }
 0x1c8   :  { %v588_v5 = vpop.f32.mrf.mxu1 }
 0x1c9   :  { %v589_v7 = vadd.f32 %v1433_v3, %v588_v5  ;;  %v1378_v5 = vld [vmem:[#allocation5 + $0x148] sm:$0xff] }
 0x1ca   :  { %468 = vmatpush.bf16.msrb.mxu2 %v1378_v5 }
 0x1cb   :  { %v591_v9 = vadd.f32 %v589_v7, %v587_v6 }
 0x1cd   :  { %v340_v10 = vpop.f32.mrf.mxu3  ;;  %v592_v11 = vrot.slane %v591_v9, 4 }
 0x1ce   :  { %v341_v22 = vadd.f32 %v1434_v16, %v340_v10 }
 0x1cf   :  { %v593_v14 = vadd.f32 %v592_v11, %v591_v9 }
 0x1d1   :  { %v594_v15 = vrot.slane %v593_v14, 2 }
 0x1d3   :  { %v595_v19 = vadd.f32 %v594_v15, %v593_v14 }
 0x1d5   :  { %v342_v20 = vpop.f32.mrf.mxu3  ;;  %v596_v21 = vrot.slane %v595_v19, 1 }
 0x1d6   :  { %v343_v23 = vadd.f32 %v1434_v16, %v342_v20 }
 0x1d7   :  { %v597_v26 = vadd.f32 %v596_v21, %v595_v19 }
 0x1d8   :  { %v345_v27 = vadd.f32 %v343_v23, %v341_v22 }
 0x1d9   :  { %v598_v28 = vmul.f32 %v597_v26, %v1561_v24 }
 0x1da   :  { %v346_v29 = vrot.slane %v345_v27, 4 }
 0x1db   :  { %v1564_v32 = vsub.f32 %v587_v6, %v598_v28  ;;  %v1566_v33 = vsub.f32 %v589_v7, %v598_v28  ;;  %v1377_v7 = vld [vmem:[#allocation5 + $0x140] sm:$0xff] }
 0x1dc   :  { %v347_v34 = vadd.f32 %v346_v29, %v345_v27  ;;  %469 = vmatpush.bf16.msrb.mxu2 %v1377_v7 }
 0x1dd   :  { %v601_v35 = vmul.f32 %v1564_v32, %v1564_v32  ;;  %v602_v36 = vmul.f32 %v1566_v33, %v1566_v33 }
 0x1de   :  { %v348_v37 = vrot.slane %v347_v34, 2 }
 0x1df   :  { %v603_v41 = vadd.f32 %v602_v36, %v601_v35 }
 0x1e0   :  { %v349_v42 = vadd.f32 %v348_v37, %v347_v34  ;;  %v372_v37 = vld [vmem:[%s1634_s4 + $0x7] sm:$0x1] }
 0x1e1   :  { %v604_v43 = vrot.slane %v603_v41, 4 }
 0x1e2   :  { %v350_v44 = vrot.slane %v349_v42, 1 }
 0x1e3   :  { %v605_v47 = vadd.f32 %v604_v43, %v603_v41 }
 0x1e4   :  { %v351_v48 = vadd.f32 %v350_v44, %v349_v42 }
 0x1e5   :  { %v606_v49 = vrot.slane %v605_v47, 2 }
 0x1e6   :  { %v359_v50 = vmul.f32 %v1561_v24, %v351_v48 }
 0x1e7   :  { %v607_v53 = vadd.f32 %v606_v49, %v605_v47 }
 0x1e8   :  { %v1573_v54 = vsub.f32 %v341_v22, %v359_v50  ;;  %v1575_v55 = vsub.f32 %v343_v23, %v359_v50  ;;  %v1409_v50 = vld [vmem:[#allocation5 + $0x238] sm:$0xff] }
 0x1e9   :  { %v608_v56 = vrot.slane %v607_v53, 1  ;;  %807 = vmatpush.bf16.msra.mxu0 %v1409_v50 }
 0x1ea   :  { %v362_v57 = vmul.f32 %v1573_v54, %v1573_v54  ;;  %v363_v58 = vmul.f32 %v1575_v55, %v1575_v55 }
 0x1eb   :  { %v609_v61 = vadd.f32 %v608_v56, %v607_v53  ;;  %v1406_v56 = vld [vmem:[#allocation5 + $0x220] sm:$0xff] }
 0x1ec   :  { %v364_v62 = vadd.f32 %v363_v58, %v362_v57 }
 0x1ed   :  { %v610_v63 = vmul.f32 %v609_v61, %v1561_v24  ;;  %808 = vmatpush.bf16.msra.mxu0 %v1408_v51 }
 0x1ee   :  { %v365_v0 = vrot.slane %v364_v62, 4 }
 0x1ef   :  { %v612_v2 = vadd.f32 1e-05, %v610_v63  ;;  %v1404_v63 = vld [vmem:[#allocation5 + $0x210] sm:$0xff] }
 0x1f0   :  { %v366_v3 = vadd.f32 %v365_v0, %v364_v62  ;;  %v1403_v0 = vld [vmem:[#allocation5 + $0x208] sm:$0xff] }
 0x1f1   :  { %1445 = vrsqrt.f32 %v612_v2  ;;  %vm619_vm3 = vweird.f32 %v612_v2  ;;  %809 = vmatpush.bf16.msra.mxu0 %v1407_v52  ;;  %v1425_v52 = vld [vmem:[#allocation5 + $0x2b8] sm:$0xff] }
 0x1f2   :  { %v367_v4 = vrot.slane %v366_v3, 2  ;;  %1015 = vmatpush.bf16.msra.mxu1 %v1425_v52 }
 0x1f4   :  { %v368_v6 = vadd.f32 %v367_v4, %v366_v3  ;;  %v1438_v4 = vld [vmem:[%s1634_s4 + $0x9] ss:$0 sm:$0xff] }
 0x1f5   :  { %810 = vmatpush.bf16.msra.mxu0 %v1406_v56  ;;  %v1423_v56 = vld [vmem:[#allocation5 + $0x2a8] sm:$0xff] }
 0x1f6   :  { %v369_v8 = vrot.slane %v368_v6, 1 }
 0x1f7   :  { %v1446_v9 = vpop.eup %1445 }
 0x1f8   :  { %v370_v10 = vadd.f32 %v369_v8, %v368_v6  ;;  %v614_v11 = vmul.f32 %v1446_v9, %v612_v2  ;;  %vm620_vm2 = vweird.f32 %v1446_v9 }
 0x1f9   :  { %vm621_vm4 = vmor %vm619_vm3, %vm620_vm2 }
 0x1fa   :  { %v371_v12 = vmul.f32 %v370_v10, %v1561_v24  ;;  %v615_v13 = vmul.f32 %v1446_v9, %v614_v11 }
 0x1fc   :  { %v373_v14 = vadd.f32 1e-05, %v371_v12  ;;  %v616_v15 = vmul.f32 0.5, %v615_v13 }
 0x1fe   :  { %1447 = vrsqrt.f32 %v373_v14  ;;  %v617_v16 = vsub.f32 1.5, %v616_v15  ;;  %vm380_vm6 = vweird.f32 %v373_v14 }
 0x200   :  { %v618_v18 = vmul.f32 %v1446_v9, %v617_v16 }
 0x202   :  { %v622_v19 = vsel %vm621_vm4, %v1446_v9, %v618_v18 }
 0x203   :  { %v623_v21 = vmul.f32 %v622_v19, %v611_v17  ;;  %v1439_v17 = vld [vmem:[%s1634_s4 + $0xe] ss:$0 sm:$0xff] }
 0x204   :  { %v1448_v20 = vpop.eup %1447 }
 0x205   :  { %v375_v22 = vmul.f32 %v1448_v20, %v373_v14  ;;  %v624_v23 = vperm.slane %v623_v21, 0  ;;  %vm381_vm5 = vweird.f32 %v1448_v20 }
 0x206   :  { %vm382_vm7 = vmor %vm380_vm6, %vm381_vm5 }
 0x207   :  { %v376_v26 = vmul.f32 %v1448_v20, %v375_v22  ;;  %v626_v27 = vmul.f32 %v624_v23, %v1566_v33  ;;  %v625_v28 = vmul.f32 %v624_v23, %v1564_v32  ;;  %v1436_v32 = vld [vmem:[%s1634_s4 + $0x8] ss:$0 sm:$0xff]  ;;  %v1417_v23 = vld [vmem:[#allocation5 + $0x278] sm:$0xff] }
 0x209   :  { %v377_v29 = vmul.f32 0.5, %v376_v26  ;;  %v629_v30 = vadd.f32 %v1435_v25, %v625_v28  ;;  %v630_v31 = vadd.f32 %v1435_v25, %v626_v27  ;;  %v1416_v27 = vld [vmem:[#allocation5 + $0x270] sm:$0xff] }
 0x20b   :  { %v378_v34 = vsub.f32 1.5, %v377_v29  ;;  %v631_v35 = vmax.f32 %v629_v30, 0.0  ;;  %v632_v36 = vmax.f32 %v630_v31, 0.0  ;;  %v1415_v30 = vld [vmem:[#allocation5 + $0x268] sm:$0xff] }
 0x20d   :  { %v379_v38 = vmul.f32 %v1448_v20, %v378_v34  ;;  %v633_v40 = vpack.c.bf16 %v632_v36, %v631_v35  ;;  %v1414_v35 = vld [vmem:[#allocation5 + $0x260] sm:$0xff] }
 0x20f   :  { %v383_v41 = vsel %vm382_vm7, %v1448_v20, %v379_v38  ;;  %709 = vmatmul.bf16.vlgmr.msrb.gmra.mxu3 %v633_v40 }
 0x210   :  { %v384_v42 = vmul.f32 %v383_v41, %v372_v37  ;;  %v1413_v41 = vld [vmem:[#allocation5 + $0x258] sm:$0xff] }
 0x212   :  { %v385_v33 = vperm.slane %v384_v42, 0 }
 0x214   :  { %v387_v43 = vmul.f32 %v385_v33, %v1575_v55  ;;  %v386_v44 = vmul.f32 %v385_v33, %v1573_v54  ;;  %v1437_v55 = vld [vmem:[%s1634_s4 + $0x5] ss:$0 sm:$0xff]  ;;  %v1405_v54 = vld [vmem:[#allocation5 + $0x218] sm:$0xff] }
 0x215   :  { %811 = vmatpush.bf16.msra.mxu0 %v1405_v54 }
 0x216   :  { %v390_v45 = vadd.f32 %v1436_v32, %v386_v44  ;;  %v391_v46 = vadd.f32 %v1436_v32, %v387_v43  ;;  %v1412_v32 = vld [vmem:[#allocation5 + $0x250] sm:$0xff] }
 0x218   :  { %v392_v47 = vmax.f32 %v390_v45, 0.0  ;;  %v393_v48 = vmax.f32 %v391_v46, 0.0  ;;  %v1411_v45 = vld [vmem:[#allocation5 + $0x248] sm:$0xff] }
 0x219   :  { %812 = vmatpush.bf16.msra.mxu0 %v1404_v63 }
 0x21a   :  { %v394_v49 = vpack.c.bf16 %v393_v48, %v392_v47  ;;  %v1410_v48 = vld [vmem:[#allocation5 + $0x240] sm:$0xff] }
 0x21c   :  { %470 = vmatmul.bf16.vlgmr.msrb.gmra.mxu2 %v394_v49 }
 0x21d   :  { %813 = vmatpush.bf16.msra.mxu0 %v1403_v0 }
 0x221   :  { %814 = vmatpush.bf16.msra.mxu0 %v1402_v1  ;;  %v1440_v1 = vld [vmem:[%s1634_s4 + $0x10] ss:$0 sm:$0xff] }
 0x292   :  { %v710_v53 = vpop.f32.mrf.mxu3 }
 0x293   :  { %v711_v57 = vadd.f32 %v1437_v55, %v710_v53  ;;  %v1424_v53 = vld [vmem:[#allocation5 + $0x2b0] sm:$0xff] }
 0x294   :  { %1016 = vmatpush.bf16.msra.mxu1 %v1424_v53 }
 0x295   :  { %v715_v60 = vmax.f32 %v711_v57, 0.0  ;;  %v1422_v57 = vld [vmem:[#allocation5 + $0x2a0] sm:$0xff] }
 0x298   :  { %1017 = vmatpush.bf16.msra.mxu1 %v1423_v56 }
 0x29a   :  { %v712_v58 = vpop.f32.mrf.mxu3 }
 0x29b   :  { %v713_v59 = vadd.f32 %v1437_v55, %v712_v58 }
 0x29c   :  { %1018 = vmatpush.bf16.msra.mxu1 %v1422_v57 }
 0x29d   :  { %v716_v61 = vmax.f32 %v713_v59, 0.0 }
 0x29f   :  { %v717_v62 = vpack.c.bf16 %v716_v61, %v715_v60  ;;  %v471_v2 = vpop.f32.mrf.mxu2 }
 0x2a0   :  { %v472_v5 = vadd.f32 %v1438_v4, %v471_v2 }
 0x2a1   :  { %726 = vmatpush.bf16.msra.mxu2 %v717_v62 }
 0x2a2   :  { %v476_v8 = vmax.f32 %v472_v5, 0.0 }
 0x2a4   :  { %1253 = vmatmul.msk.bf16.vlgmr.msra.gmra.mxu2 %vm239_vm0, %v1547_v39  ;;  %v734_v39 = vstv %s733_s1 }
 0x2a5   :  { %v735_v10 = vmul.f32 %v734_v39, %v476_v8  ;;  %931 = vmatpush.bf16.msrb.mxu2 %v1417_v23 }
 0x2a7   :  { %v473_v3 = vpop.f32.mrf.mxu2 }
 0x2a8   :  { %v474_v6 = vadd.f32 %v1438_v4, %v473_v3 }
 0x2a9   :  { %932 = vmatpush.bf16.msrb.mxu2 %v1416_v27 }
 0x2aa   :  { %v477_v9 = vmax.f32 %v474_v6, 0.0 }
 0x2ac   :  { %v736_v11 = vmul.f32 %v734_v39, %v477_v9  ;;  %v1421_v9 = vld [vmem:[#allocation5 + $0x298] sm:$0xff]  ;;  %v1420_v39 = vld [vmem:[#allocation5 + $0x290] sm:$0xff] }
 0x2ad   :  { %933 = vmatpush.bf16.msrb.mxu2 %v1415_v30  ;;  %1019 = vmatpush.bf16.msra.mxu1 %v1421_v9 }
 0x2b1   :  { %934 = vmatpush.bf16.msrb.mxu2 %v1414_v35  ;;  %1020 = vmatpush.bf16.msra.mxu1 %v1420_v39 }
 0x2b5   :  { %935 = vmatpush.bf16.msrb.mxu2 %v1413_v41 }
 0x2b9   :  { %936 = vmatpush.bf16.msrb.mxu2 %v1412_v32 }
 0x2bd   :  { %937 = vmatpush.bf16.msrb.mxu2 %v1411_v45 }
 0x2c1   :  { %938 = vmatpush.bf16.msrb.mxu2 %v1410_v48 }
 0x327   :  { %v728_v7 = vpop.f32.mrf.mxu2 }
 0x328   :  { %v737_v13 = vadd.f32 %v735_v10, %v728_v7  ;;  %v1419_v10 = vld [vmem:[#allocation5 + $0x288] sm:$0xff] }
 0x329   :  { %1021 = vmatpush.bf16.msra.mxu1 %v1419_v10 }
 0x32f   :  { %v730_v12 = vpop.f32.mrf.mxu2 }
 0x330   :  { %v738_v14 = vadd.f32 %v736_v11, %v730_v12  ;;  %v1418_v11 = vld [vmem:[#allocation5 + $0x280] sm:$0xff] }
 0x331   :  { %1022 = vmatpush.bf16.msra.mxu1 %v1418_v11 }
 0x332   :  { %v739_v15 = vpack.c.bf16 %v738_v14, %v737_v13  ;;  %v1441_v13 = vld [vmem:[%s1634_s4 + $0x11] ss:$0 sm:$0xff] }
 0x334   :  { %815 = vmatmul.bf16.vlgmr.msra.gmra.mxu0 %v739_v15 }
 0x3b1   :  { %v816_v16 = vpop.f32.mrf.mxu0 }
 0x3b2   :  { %v817_v19 = vadd.f32 %v1439_v17, %v816_v16 }
 0x3b9   :  { %v818_v18 = vpop.f32.mrf.mxu0 }
 0x3ba   :  { %v819_v20 = vadd.f32 %v1439_v17, %v818_v18 }
 0x3bc   :  { %v821_v21 = vadd.f32 %v819_v20, %v817_v19 }
 0x3be   :  { %v822_v22 = vrot.slane %v821_v21, 4 }
 0x3c0   :  { %v823_v25 = vadd.f32 %v822_v22, %v821_v21 }
 0x3c2   :  { %v824_v26 = vrot.slane %v823_v25, 2 }
 0x3c4   :  { %v825_v28 = vadd.f32 %v824_v26, %v823_v25 }
 0x3c6   :  { %v826_v29 = vrot.slane %v825_v28, 1 }
 0x3c8   :  { %v827_v31 = vadd.f32 %v826_v29, %v825_v28 }
 0x3ca   :  { %v828_v34 = vmul.f32 %v827_v31, %v1561_v24 }
 0x3cc   :  { %v829_v36 = vsub.f32 %v817_v19, %v828_v34  ;;  %v830_v37 = vsub.f32 %v819_v20, %v828_v34  ;;  %v1442_v20 = vld [vmem:[%s1634_s4 + $0x12] ss:$0 sm:$0xff] }
 0x3ce   :  { %v831_v38 = vmul.f32 %v829_v36, %v829_v36  ;;  %v832_v40 = vmul.f32 %v830_v37, %v830_v37 }
 0x3d0   :  { %v833_v42 = vadd.f32 %v832_v40, %v831_v38 }
 0x3d2   :  { %v834_v33 = vrot.slane %v833_v42, 4 }
 0x3d4   :  { %v835_v43 = vadd.f32 %v834_v33, %v833_v42 }
 0x3d6   :  { %v836_v44 = vrot.slane %v835_v43, 2 }
 0x3d8   :  { %v837_v46 = vadd.f32 %v836_v44, %v835_v43 }
 0x3da   :  { %v838_v47 = vrot.slane %v837_v46, 1 }
 0x3dc   :  { %v839_v49 = vadd.f32 %v838_v47, %v837_v46 }
 0x3de   :  { %v840_v50 = vmul.f32 %v839_v49, %v1561_v24  ;;  %v841_v24 = vld [vmem:[%s1634_s4 + $0xf] sm:$0x1] }
 0x3e0   :  { %v842_v51 = vadd.f32 1e-05, %v840_v50 }
 0x3e2   :  { %1449 = vrsqrt.f32 %v842_v51  ;;  %vm849_vm9 = vweird.f32 %v842_v51 }
 0x3e8   :  { %v1450_v55 = vpop.eup %1449 }
 0x3e9   :  { %v844_v54 = vmul.f32 %v1450_v55, %v842_v51  ;;  %vm850_vm8 = vweird.f32 %v1450_v55 }
 0x3ea   :  { %vm851_vm10 = vmor %vm849_vm9, %vm850_vm8 }
 0x3eb   :  { %v845_v58 = vmul.f32 %v1450_v55, %v844_v54 }
 0x3ed   :  { %v846_v59 = vmul.f32 0.5, %v845_v58 }
 0x3ef   :  { %v847_v60 = vsub.f32 1.5, %v846_v59 }
 0x3f1   :  { %v848_v61 = vmul.f32 %v1450_v55, %v847_v60 }
 0x3f3   :  { %v852_v62 = vsel %vm851_vm10, %v1450_v55, %v848_v61 }
 0x3f4   :  { %v853_v63 = vmul.f32 %v852_v62, %v841_v24 }
 0x3f6   :  { %v854_v0 = vperm.slane %v853_v63, 0 }
 0x3f8   :  { %v855_v2 = vmul.f32 %v854_v0, %v829_v36  ;;  %v856_v3 = vmul.f32 %v854_v0, %v830_v37 }
 0x3fa   :  { %v860_v4 = vadd.f32 %v1440_v1, %v856_v3  ;;  %v859_v5 = vadd.f32 %v1440_v1, %v855_v2 }
 0x3fc   :  { %v862_v6 = vmax.f32 %v860_v4, 0.0  ;;  %v861_v7 = vmax.f32 %v859_v5, 0.0 }
 0x3fe   :  { %v863_v8 = vpack.c.bf16 %v862_v6, %v861_v7 }
 0x400   :  { %939 = vmatmul.bf16.vlgmr.msrb.gmra.mxu2 %v863_v8 }
 0x483   :  { %v940_v12 = vpop.f32.mrf.mxu2 }
 0x484   :  { %v941_v14 = vadd.f32 %v1441_v13, %v940_v12 }
 0x486   :  { %v945_v17 = vmax.f32 %v941_v14, 0.0 }
 0x48b   :  { %v942_v15 = vpop.f32.mrf.mxu2 }
 0x48c   :  { %v943_v16 = vadd.f32 %v1441_v13, %v942_v15 }
 0x48e   :  { %v946_v18 = vmax.f32 %v943_v16, 0.0 }
 0x490   :  { %v947_v19 = vpack.c.bf16 %v946_v18, %v945_v17 }
 0x492   :  { %1023 = vmatmul.bf16.vlgmr.msra.gmra.mxu1 %v947_v19 }
 0x50f   :  { %v1024_v21 = vpop.f32.mrf.mxu1 }
 0x510   :  { %v1025_v22 = vadd.f32 %v1442_v20, %v1024_v21 }
 0x512   :  { %1029 = vst [vmem:[%s1635_s5] sm:$0xff] %v1025_v22 }
 0x517   :  { %v1026_v23 = vpop.f32.mrf.mxu1 }
 0x518   :  { %v1027_v25 = vadd.f32 %v1442_v20, %v1026_v23 }
 0x51a   :  { %1030 = vst [vmem:[%s1635_s5 + $0x8] sm:$0xff] %v1027_v25 }
 0x51b   :  { %1035 = vsyncpa [#allocation3], 1 }
 0x51c   :  { %1036 = vsyncpa [#allocation4], 1 }

</bundles_post_ra>
